<compile_context>
chip_gen: v7x
topology: tpu7x:2x2x1
jax: 0.10.0
libtpu: 0.0.40
codegen_flags: <defaults>
</compile_context>

<pallas_src>
import jax
import jax.numpy as jnp
from jax.experimental import pallas as pl
from jax.experimental.pallas import tpu as pltpu


def _round_up(n, m):
    return ((n + m - 1) // m) * m


# ---------------------------------------------------------------------------
# Shared per-step math (used by both the single-step and the fused kernels).
# All weight slabs are sliced with static offsets (free) and every matmul is a
# lane-dense MXU push.
# ---------------------------------------------------------------------------
def _decoder_step_math(query, topics_flat, cov, phi, x,
                       h0_0, h0_1, c0_0, c0_1,
                       att_proj_ref, att_mix_ref, lstm_w_ref, bias_ref,
                       K, H, E):
    f32 = jnp.float32
    KE, KH = K * E, K * H
    rA = _round_up(KE, 8)        # row offsets inside the slabs (8-sublane aligned)
    rV = _round_up(KH, 8)
    rE = _round_up(K, 8)
    B = cov.shape[0]

    # ---- Bahdanau (MLP) attention, fully lane-dense ----------------------
    # proj_key for all K topics: (B, K*E) @ block_diag(Ua^T) -> (B, K*H)
    proj_key = jnp.dot(topics_flat, att_proj_ref[0:KE, :],
                       preferred_element_type=f32)
    # q after 1..K applications of Wa: one push against precomputed (Wa^T)^(k+1) powers
    q_all = jnp.dot(query, att_proj_ref[rA:rA + H, :],
                    preferred_element_type=f32)
    t = jnp.tanh(q_all + proj_key)                                   # (B, KH)

    va_b = bias_ref[2:3, 0:K]                                        # (1, K)
    scores = (jnp.dot(t, att_mix_ref[0:KH, :],
                      preferred_element_type=f32)[:, 0:K] + va_b) * cov   # (B, K)

    # softmax over topics (exact path; tolerance-critical)
    m = jnp.max(scores, axis=1, keepdims=True)
    e = jnp.exp(scores - m)
    alphas = e / jnp.sum(e, axis=1, keepdims=True)
    # (swap to `e * pl.reciprocal(sum, approx=True)` if ~1e-3 rel. error is acceptable)

    # context vector mt = sum_k alphas[:,k] * topics[:,k,:]  -- via block matrices,
    # so everything stays in full-128-lane vregs (no lane repeats / sub-lane reductions).
    if rE > K:
        alphas_p = jnp.concatenate(
            [alphas, jnp.zeros((B, rE - K), f32)], axis=1)           # (B, rE)
    else:
        alphas_p = alphas
    alpha_rep = jnp.dot(alphas_p, att_mix_ref[rV:rV + rE, :],
                        preferred_element_type=f32)                  # (B, KE)
    mt = jnp.dot(topics_flat * alpha_rep,
                 att_mix_ref[rV + rE:rV + rE + KE, 0:E],
                 preferred_element_type=f32)                         # (B, E)

    cov_new = cov - alphas / phi                                     # exact (matches reference)

    # ---- 2-layer LSTM, single time step (W_ih_l0 pre-split: no lane concat of [x, mt]) ----
    b0 = bias_ref[0:1, :]
    b1 = bias_ref[1:2, :]

    pre0 = (jnp.dot(x,    lstm_w_ref[0:E, :],              preferred_element_type=f32)
            + jnp.dot(mt,   lstm_w_ref[E:2 * E, :],          preferred_element_type=f32)
            + jnp.dot(h0_0, lstm_w_ref[2 * E:2 * E + H, :],  preferred_element_type=f32)
            + b0)                                                    # (B, 4H)
    # NOTE: 32-lane gate slices are fine at H=32; switch to a gate-major weight layout
    # host-side if H ever scales to >=128.
    i0 = jax.nn.sigmoid(pre0[:, 0:H])
    f0 = jax.nn.sigmoid(pre0[:, H:2 * H])
    g0 = jnp.tanh(pre0[:, 2 * H:3 * H])
    o0 = jax.nn.sigmoid(pre0[:, 3 * H:4 * H])
    c_l0 = f0 * c0_0 + i0 * g0
    h_l0 = o0 * jnp.tanh(c_l0)

    pre1 = (jnp.dot(h_l0, lstm_w_ref[2 * E + H:2 * E + 2 * H, :],     preferred_element_type=f32)
            + jnp.dot(h0_1, lstm_w_ref[2 * E + 2 * H:2 * E + 3 * H, :], preferred_element_type=f32)
            + b1)                                                    # (B, 4H)
    i1 = jax.nn.sigmoid(pre1[:, 0:H])
    f1 = jax.nn.sigmoid(pre1[:, H:2 * H])
    g1 = jnp.tanh(pre1[:, 2 * H:3 * H])
    o1 = jax.nn.sigmoid(pre1[:, 3 * H:4 * H])
    c_l1 = f1 * c0_1 + i1 * g1
    h_l1 = o1 * jnp.tanh(c_l1)

    return alphas, cov_new, h_l0, h_l1, c_l0, c_l1


# ---------------------------------------------------------------------------
# Single-step kernel (module-equivalent forward).
# ---------------------------------------------------------------------------
def _single_step_kernel(query_ref, topics_ref, cov_ref, phi_ref, x_ref,
                        h0_ref, c0_ref,
                        att_proj_ref, att_mix_ref, lstm_w_ref, bias_ref,
                        state_ref, att_ref):
    B, K = cov_ref.shape
    H = query_ref.shape[1]
    E = x_ref.shape[1]

    alphas, cov_new, h_l0, h_l1, c_l0, c_l1 = _decoder_step_math(
        query_ref[...], topics_ref[...], cov_ref[...], phi_ref[...], x_ref[...],
        h0_ref[0], h0_ref[1], c0_ref[0], c0_ref[1],
        att_proj_ref, att_mix_ref, lstm_w_ref, bias_ref, K, H, E)

    # packed, lane-dense outputs (one unmasked (B,4H) store + one (B,2K) store)
    state_ref[...] = jnp.concatenate([h_l0, h_l1, c_l0, c_l1], axis=1)
    att_ref[...] = jnp.concatenate([alphas, cov_new], axis=1)


# ---------------------------------------------------------------------------
# Fused T-step kernel: grid over decode steps, weights VMEM-resident,
# h / c / coverage / query carried in VMEM scratch.
# ---------------------------------------------------------------------------
def _fused_kernel(x_ref, query0_ref, topics_ref, cov0_ref, phi_ref, h0_ref, c0_ref,
                  att_proj_ref, att_mix_ref, lstm_w_ref, bias_ref,
                  y_ref, att_ref, state_ref,
                  q_s, cov_s, h_s, c_s):
    t = pl.program_id(0)
    B, K = cov0_ref.shape
    H = query0_ref.shape[1]
    E = x_ref.shape[2]

    @pl.when(t == 0)
    def _():
        q_s[...] = query0_ref[...]
        cov_s[...] = cov0_ref[...]
        h_s[...] = h0_ref[...]
        c_s[...] = c0_ref[...]

    alphas, cov_new, h_l0, h_l1, c_l0, c_l1 = _decoder_step_math(
        q_s[...], topics_ref[...], cov_s[...], phi_ref[...], x_ref[0],
        h_s[0], h_s[1], c_s[0], c_s[1],
        att_proj_ref, att_mix_ref, lstm_w_ref, bias_ref, K, H, E)

    # carry state to the next grid step (scratch persists across iterations)
    q_s[...] = h_l1
    cov_s[...] = cov_new
    h_s[0] = h_l0
    h_s[1] = h_l1
    c_s[0] = c_l0
    c_s[1] = c_l1

    # per-step outputs
    y_ref[0] = h_l1
    att_ref[0] = jnp.concatenate([alphas, cov_new], axis=1)
    # final packed state: constant block index -> resident, written back once at the end
    state_ref[...] = jnp.concatenate([h_l0, h_l1, c_l0, c_l1], axis=1)


# ---------------------------------------------------------------------------
# One-time parameter preparation: 11 PyTorch weight tensors -> 4 lane-dense slabs.
# ---------------------------------------------------------------------------
def prepare_params(params, K):
    f32 = jnp.float32
    H = params["Wa"].shape[0]
    E = params["Ua"].shape[1]
    KE, KH, H4 = K * E, K * H, 4 * H
    assert H4 >= K, "bias slab packs va_b into the first K lanes of a 4H-wide row"
    rA = _round_up(KE, 8)
    rV = _round_up(KH, 8)
    rE = _round_up(K, 8)

    UaT = params["Ua"].astype(f32).T               # (E, H)
    WaT = params["Wa"].astype(f32).T               # (H, H)
    va_w = params["va_w"].astype(f32).reshape(H)
    va_b = params["va_b"].astype(f32).reshape(())

    # slab 1: [ block_diag(Ua^T)  (rA rows) ; (Wa^T)^(k+1) powers (H rows) ]  lanes = K*H
    ua_blk = jnp.zeros((rA, KH), f32)
    for k in range(K):
        ua_blk = ua_blk.at[k * E:(k + 1) * E, k * H:(k + 1) * H].set(UaT)
    p = jnp.eye(H, dtype=f32)
    pows = []
    for _ in range(K):
        p = jnp.dot(p, WaT, precision=jax.lax.Precision.HIGHEST)
        pows.append(p)
    wa_pows = jnp.concatenate(pows, axis=1)        # (H, KH)
    att_proj = jnp.concatenate([ua_blk, wa_pows], axis=0)

    # slab 2: [ block va (rV rows) ; block "repeat" (rE rows) ; summed identity (KE rows) ]
    # lane width = K*E (narrower pieces zero-padded on lanes).
    vblk = jnp.zeros((rV, KE), f32)
    for k in range(K):
        vblk = vblk.at[k * H:(k + 1) * H, k].set(va_w)
    erep = jnp.zeros((rE, KE), f32)
    for k in range(K):
        erep = erep.at[k, k * E:(k + 1) * E].set(1.0)
    sumi = jnp.zeros((KE, KE), f32)
    eye_e = jnp.eye(E, dtype=f32)
    for k in range(K):
        sumi = sumi.at[k * E:(k + 1) * E, 0:E].set(eye_e)
    att_mix = jnp.concatenate([vblk, erep, sumi], axis=0)

    # slab 3: LSTM weights (W_ih_l0 split into x-half / mt-half so the kernel never concats)
    lstm_w = jnp.concatenate([
        params["W_ih_l0"][:, :E].T,   # (E, 4H)  x-half
        params["W_ih_l0"][:, E:].T,   # (E, 4H)  mt-half
        params["W_hh_l0"].T,          # (H, 4H)
        params["W_ih_l1"].T,          # (H, 4H)
        params["W_hh_l1"].T,          # (H, 4H)
    ], axis=0).astype(f32)            # (2E + 3H, 4H)

    # slab 4: biases (b_ih + b_hh folded) + a row carrying va_b
    b0 = (params["b_ih_l0"] + params["b_hh_l0"]).reshape(1, H4)
    b1 = (params["b_ih_l1"] + params["b_hh_l1"]).reshape(1, H4)
    vb_row = jnp.full((1, H4), va_b, f32)
    bias = jnp.concatenate([b0, b1, vb_row], axis=0).astype(f32)   # (3, 4H)

    return {"att_proj": att_proj, "att_mix": att_mix, "lstm_w": lstm_w, "bias": bias}


# ---------------------------------------------------------------------------
# Wrappers
# ---------------------------------------------------------------------------
def attention_decoder(prepped, inp, output, hidden, phi, topics, coverage_vector):
    """Single decode step, identical interface/semantics to the PyTorch module.
    inp:(1,B,E) output:(1,B,H) hidden:(h0,c0) each (2,B,H) phi:(B,K) topics:(B,K,E)
    coverage_vector:(B,K) -> (output(1,B,H), (h_n,c_n), score(B,K), new_cov(B,K))"""
    h0, c0 = hidden
    B, K, E = topics.shape
    H = h0.shape[-1]
    assert h0.shape[0] == 2, "kernel is specialized to num_layers=2 (as in the reference)"

    topics_flat = topics.reshape(B, K * E)      # free collapse of trailing dims
    vmem = pl.BlockSpec(memory_space=pltpu.MemorySpace.VMEM)
    args = (output[0], topics_flat, coverage_vector, phi, inp[0], h0, c0,
            prepped["att_proj"], prepped["att_mix"], prepped["lstm_w"], prepped["bias"])

    state, att = pl.pallas_call(
        _single_step_kernel,
        out_shape=(
            jax.ShapeDtypeStruct((B, 4 * H), jnp.float32),   # [h_l0 | h_l1 | c_l0 | c_l1]
            jax.ShapeDtypeStruct((B, 2 * K), jnp.float32),   # [alphas | cov_new]
        ),
        in_specs=[vmem] * len(args),
        out_specs=(vmem, vmem),
    )(*args)

    h_n = jnp.stack([state[:, 0:H], state[:, H:2 * H]])
    c_n = jnp.stack([state[:, 2 * H:3 * H], state[:, 3 * H:4 * H]])
    score = att[:, 0:K]
    cov_new = att[:, K:2 * K]
    return h_n[1:], (h_n, c_n), score, cov_new


def attention_decoder_fused(prepped, inp_seq, output0, hidden0, phi, topics, coverage_vector):
    """T teacher-forced decode steps in ONE pallas_call (grid over steps).
    Equivalent to calling the module T times, feeding its rnn output back as the next
    query and chaining hidden state / coverage.  Weights + constant activations are
    loaded into VMEM once; per-step state is carried in VMEM scratch."""
    h0, c0 = hidden0
    T, B, E = inp_seq.shape
    _, K, _ = topics.shape
    H = h0.shape[-1]
    assert h0.shape[0] == 2

    query0 = output0[0]
    topics_flat = topics.reshape(B, K * E)
    att_proj, att_mix = prepped["att_proj"], prepped["att_mix"]
    lstm_w, bias = prepped["lstm_w"], prepped["bias"]

    def full_const(arr):
        nd = arr.ndim
        return pl.BlockSpec(arr.shape, lambda t, _nd=nd: (0,) * _nd)

    grid_spec = pltpu.PrefetchScalarGridSpec(
        num_scalar_prefetch=0,
        grid=(T,),
        in_specs=[
            pl.BlockSpec((1, B, E), lambda t: (t, 0, 0)),   # x_t (only per-step DMA)
            full_const(query0),
            full_const(topics_flat),
            full_const(coverage_vector),
            full_const(phi),
            full_const(h0),
            full_const(c0),
            full_const(att_proj),
            full_const(att_mix),
            full_const(lstm_w),
            full_const(bias),
        ],
        out_specs=[
            pl.BlockSpec((1, B, H), lambda t: (t, 0, 0)),       # per-step rnn output
            pl.BlockSpec((1, B, 2 * K), lambda t: (t, 0, 0)),   # per-step [alphas | cov]
            pl.BlockSpec((B, 4 * H), lambda t: (0, 0)),         # final packed state (resident)
        ],
        scratch_shapes=[
            pltpu.VMEM((B, H), jnp.float32),      # carried query
            pltpu.VMEM((B, K), jnp.float32),      # carried coverage
            pltpu.VMEM((2, B, H), jnp.float32),   # carried h
            pltpu.VMEM((2, B, H), jnp.float32),   # carried c
        ],
    )

    y_seq, att_seq, state = pl.pallas_call(
        _fused_kernel,
        out_shape=(
            jax.ShapeDtypeStruct((T, B, H), jnp.float32),
            jax.ShapeDtypeStruct((T, B, 2 * K), jnp.float32),
            jax.ShapeDtypeStruct((B, 4 * H), jnp.float32),
        ),
        grid_spec=grid_spec,
        compiler_params=pltpu.CompilerParams(dimension_semantics=("arbitrary",)),
    )(inp_seq, query0, topics_flat, coverage_vector, phi, h0, c0,
      att_proj, att_mix, lstm_w, bias)

    h_n = jnp.stack([state[:, 0:H], state[:, H:2 * H]])
    c_n = jnp.stack([state[:, 2 * H:3 * H], state[:, 3 * H:4 * H]])
    scores_seq = att_seq[:, :, 0:K]
    cov_seq = att_seq[:, :, K:2 * K]
    return y_seq, (h_n, c_n), scores_seq, cov_seq


# ---------------------------------------------------------------------------
# Parameter init + pure-JAX reference (ports the PyTorch forward for validation)
# ---------------------------------------------------------------------------
def make_params(key, hidden_size, embed_size):
    H, E = hidden_size, embed_size
    ks = jax.random.split(key, 16)
    u = lambda k, shape, scale: jax.random.uniform(k, shape, jnp.float32, -scale, scale)
    sH = 1.0 / jnp.sqrt(H)
    sE = 1.0 / jnp.sqrt(E)
    return {
        "Ua": u(ks[0], (H, E), sE),
        "Wa": u(ks[1], (H, H), sH),
        "va_w": u(ks[2], (1, H), sH),
        "va_b": u(ks[3], (1,), sH),
        "W_ih_l0": u(ks[4], (4 * H, 2 * E), sH),
        "W_hh_l0": u(ks[5], (4 * H, H), sH),
        "b_ih_l0": u(ks[6], (4 * H,), sH),
        "b_hh_l0": u(ks[7], (4 * H,), sH),
        "W_ih_l1": u(ks[8], (4 * H, H), sH),
        "W_hh_l1": u(ks[9], (4 * H, H), sH),
        "b_ih_l1": u(ks[10], (4 * H,), sH),
        "b_hh_l1": u(ks[11], (4 * H,), sH),
    }


def reference_forward(params, inp, output, hidden, phi, topics, coverage_vector):
    h0, c0 = hidden
    B, K, E = topics.shape
    H = h0.shape[-1]
    query = output[0]
    va_w = params["va_w"].reshape(1, H)
    va_b = params["va_b"].reshape(1, 1)
    cols = []
    q = query
    for i in range(K):
        proj_key = topics[:, i, :] @ params["Ua"].T
        q = q @ params["Wa"].T
        s = jnp.tanh(q + proj_key) @ va_w.T + va_b
        cols.append(s * coverage_vector[:, i:i + 1])
    scores = jnp.concatenate(cols, axis=1)
    alphas = jax.nn.softmax(scores, axis=1)
    mt = jnp.einsum("bk,bke->be", alphas, topics)
    cov_new = coverage_vector - alphas / phi
    x = jnp.concatenate([inp[0], mt], axis=1)

    def cell(x_in, h, c, Wih, Whh, bih, bhh):
        g = x_in @ Wih.T + bih + h @ Whh.T + bhh
        i_g = jax.nn.sigmoid(g[:, :H])
        f_g = jax.nn.sigmoid(g[:, H:2 * H])
        g_g = jnp.tanh(g[:, 2 * H:3 * H])
        o_g = jax.nn.sigmoid(g[:, 3 * H:])
        c2 = f_g * c + i_g * g_g
        return o_g * jnp.tanh(c2), c2

    h_l0, c_l0 = cell(x, h0[0], c0[0], params["W_ih_l0"], params["W_hh_l0"],
                      params["b_ih_l0"], params["b_hh_l0"])
    h_l1, c_l1 = cell(h_l0, h0[1], c0[1], params["W_ih_l1"], params["W_hh_l1"],
                      params["b_ih_l1"], params["b_hh_l1"])
    return h_l1[None], (jnp.stack([h_l0, h_l1]), jnp.stack([c_l0, c_l1])), alphas, cov_new


if __name__ == "__main__":
    B, K, E, H, L = 2, 4, 32, 32, 2   # batch, num_topics, embed_size, hidden_size, num_layers
    T = 8                              # fused decode steps

    key = jax.random.PRNGKey(0)
    kp, k1, k2, k3, k4, k5, k6, k7 = jax.random.split(key, 8)

    params = make_params(kp, H, E)
    prepped = prepare_params(params, K)   # one-time weight prep (4 lane-dense slabs)

    inp = jax.random.normal(k1, (1, B, E), jnp.float32)
    output = jax.random.normal(k2, (1, B, H), jnp.float32)
    h0 = jax.random.normal(k3, (L, B, H), jnp.float32)
    c0 = jax.random.normal(k4, (L, B, H), jnp.float32)
    topics_arr = jax.random.normal(k5, (B, K, E), jnp.float32)
    coverage_vector = jnp.ones((B, K), jnp.float32)
    phi = jax.random.uniform(k6, (B, K), jnp.float32, 1.0, 2.0)

    # ---- single-step (module-equivalent) path ----------------------------
    step = jax.jit(attention_decoder)
    out, (h_n, c_n), score, cov_new = step(
        prepped, inp, output, (h0, c0), phi, topics_arr, coverage_vector)
    jax.block_until_ready((out, h_n, c_n, score, cov_new))

    assert out.shape == (1, B, H)
    assert h_n.shape == (L, B, H) and c_n.shape == (L, B, H)
    assert score.shape == (B, K) and cov_new.shape == (B, K)

    r_out, (r_h, r_c), r_score, r_cov = reference_forward(
        params, inp, output, (h0, c0), phi, topics_arr, coverage_vector)
    tol = dict(atol=1e-4, rtol=1e-4)
    assert jnp.allclose(out, r_out, **tol)
    assert jnp.allclose(h_n, r_h, **tol) and jnp.allclose(c_n, r_c, **tol)
    assert jnp.allclose(score, r_score, **tol)
    assert jnp.allclose(cov_new, r_cov, **tol)

    # ---- fused T-step teacher-forced decode loop (one pallas_call) -------
    inp_seq = jax.random.normal(k7, (T, B, E), jnp.float32)
    fused = jax.jit(attention_decoder_fused)
    y_seq, (fh_n, fc_n), score_seq, cov_seq = fused(
        prepped, inp_seq, output, (h0, c0), phi, topics_arr, coverage_vector)
    jax.block_until_ready((y_seq, fh_n, fc_n, score_seq, cov_seq))

    assert y_seq.shape == (T, B, H)
    assert score_seq.shape == (T, B, K) and cov_seq.shape == (T, B, K)

    # reference: drive the pure-JAX module forward T times, feeding back output/hidden/coverage
    q_ref, hid_ref, cov_ref = output, (h0, c0), coverage_vector
    ys, scs, covs = [], [], []
    for t in range(T):
        q_ref, hid_ref, sc_t, cov_ref = reference_forward(
            params, inp_seq[t][None], q_ref, hid_ref, phi, topics_arr, cov_ref)
        ys.append(q_ref[0]); scs.append(sc_t); covs.append(cov_ref)
    ys = jnp.stack(ys); scs = jnp.stack(scs); covs = jnp.stack(covs)

    tol2 = dict(atol=1e-3, rtol=1e-3)   # chained steps accumulate f32 reassociation error
    assert jnp.allclose(y_seq, ys, **tol2)
    assert jnp.allclose(score_seq, scs, **tol2)
    assert jnp.allclose(cov_seq, covs, **tol2)
    assert jnp.allclose(fh_n, hid_ref[0], **tol2) and jnp.allclose(fc_n, hid_ref[1], **tol2)

    print("KERNEL_OK")
</pallas_src>

<mosaic_0001>
module attributes {stable_mosaic.version = 11 : i64} {
  func.func @_single_step_kernel(%arg0: memref<2x32xf32, #tpu.memory_space<vmem>>, %arg1: memref<2x128xf32, #tpu.memory_space<vmem>>, %arg2: memref<2x4xf32, #tpu.memory_space<vmem>>, %arg3: memref<2x4xf32, #tpu.memory_space<vmem>>, %arg4: memref<2x32xf32, #tpu.memory_space<vmem>>, %arg5: memref<2x2x32xf32, #tpu.memory_space<vmem>>, %arg6: memref<2x2x32xf32, #tpu.memory_space<vmem>>, %arg7: memref<160x128xf32, #tpu.memory_space<vmem>>, %arg8: memref<264x128xf32, #tpu.memory_space<vmem>>, %arg9: memref<160x128xf32, #tpu.memory_space<vmem>>, %arg10: memref<3x128xf32, #tpu.memory_space<vmem>>, %arg11: memref<2x128xf32, #tpu.memory_space<vmem>>, %arg12: memref<2x8xf32, #tpu.memory_space<vmem>>) attributes {dimension_semantics = [], scalar_prefetch = 0 : i64, scratch_operands = 0 : i64, tpu.core_type = #tpu.core_type<tc>} {
    %c0 = arith.constant 0 : index
    %c0_0 = arith.constant 0 : index
    %0 = vector.load %arg0[%c0, %c0_0] : memref<2x32xf32, #tpu.memory_space<vmem>>, vector<2x32xf32>
    %c0_1 = arith.constant 0 : index
    %c0_2 = arith.constant 0 : index
    %1 = vector.load %arg1[%c0_1, %c0_2] : memref<2x128xf32, #tpu.memory_space<vmem>>, vector<2x128xf32>
    %c0_3 = arith.constant 0 : index
    %c0_4 = arith.constant 0 : index
    %2 = vector.load %arg2[%c0_3, %c0_4] : memref<2x4xf32, #tpu.memory_space<vmem>>, vector<2x4xf32>
    %c0_5 = arith.constant 0 : index
    %c0_6 = arith.constant 0 : index
    %3 = vector.load %arg3[%c0_5, %c0_6] : memref<2x4xf32, #tpu.memory_space<vmem>>, vector<2x4xf32>
    %c0_7 = arith.constant 0 : index
    %c0_8 = arith.constant 0 : index
    %4 = vector.load %arg4[%c0_7, %c0_8] : memref<2x32xf32, #tpu.memory_space<vmem>>, vector<2x32xf32>
    %c0_9 = arith.constant 0 : index
    %c0_10 = arith.constant 0 : index
    %c0_11 = arith.constant 0 : index
    %5 = vector.load %arg5[%c0_9, %c0_10, %c0_11] : memref<2x2x32xf32, #tpu.memory_space<vmem>>, vector<1x2x32xf32>
    %6 = vector.shape_cast %5 : vector<1x2x32xf32> to vector<2x32xf32>
    %c1 = arith.constant 1 : index
    %c0_12 = arith.constant 0 : index
    %c0_13 = arith.constant 0 : index
    %7 = vector.load %arg5[%c1, %c0_12, %c0_13] : memref<2x2x32xf32, #tpu.memory_space<vmem>>, vector<1x2x32xf32>
    %8 = vector.shape_cast %7 : vector<1x2x32xf32> to vector<2x32xf32>
    %c0_14 = arith.constant 0 : index
    %c0_15 = arith.constant 0 : index
    %c0_16 = arith.constant 0 : index
    %9 = vector.load %arg6[%c0_14, %c0_15, %c0_16] : memref<2x2x32xf32, #tpu.memory_space<vmem>>, vector<1x2x32xf32>
    %10 = vector.shape_cast %9 : vector<1x2x32xf32> to vector<2x32xf32>
    %c1_17 = arith.constant 1 : index
    %c0_18 = arith.constant 0 : index
    %c0_19 = arith.constant 0 : index
    %11 = vector.load %arg6[%c1_17, %c0_18, %c0_19] : memref<2x2x32xf32, #tpu.memory_space<vmem>>, vector<1x2x32xf32>
    %12 = vector.shape_cast %11 : vector<1x2x32xf32> to vector<2x32xf32>
    %c0_20 = arith.constant 0 : index
    %c0_21 = arith.constant 0 : index
    %13 = vector.load %arg7[%c0_20, %c0_21] : memref<160x128xf32, #tpu.memory_space<vmem>>, vector<128x128xf32>
    %cst = arith.constant dense<0.000000e+00> : vector<2x128xf32>
    %14 = tpu.matmul %1, %13, %cst {dimension_numbers = #tpu.dot_dimension_numbers<[1], [0], [0], [1], [0, 0, 1, 1], [], []>} : vector<2x128xf32>, vector<128x128xf32>, vector<2x128xf32> -> vector<2x128xf32>
    %c128 = arith.constant 128 : index
    %c0_22 = arith.constant 0 : index
    %15 = vector.load %arg7[%c128, %c0_22] : memref<160x128xf32, #tpu.memory_space<vmem>>, vector<32x128xf32>
    %cst_23 = arith.constant dense<0.000000e+00> : vector<2x128xf32>
    %16 = tpu.matmul %0, %15, %cst_23 {dimension_numbers = #tpu.dot_dimension_numbers<[1], [0], [0], [1], [0, 0, 1, 1], [], []>} : vector<2x32xf32>, vector<32x128xf32>, vector<2x128xf32> -> vector<2x128xf32>
    %17 = arith.addf %16, %14 : vector<2x128xf32>
    %18 = math.tanh %17 : vector<2x128xf32>
    %c2 = arith.constant 2 : index
    %c0_24 = arith.constant 0 : index
    %19 = vector.load %arg10[%c2, %c0_24] : memref<3x128xf32, #tpu.memory_space<vmem>>, vector<1x4xf32>
    %c0_25 = arith.constant 0 : index
    %c0_26 = arith.constant 0 : index
    %20 = vector.load %arg8[%c0_25, %c0_26] : memref<264x128xf32, #tpu.memory_space<vmem>>, vector<128x128xf32>
    %cst_27 = arith.constant dense<0.000000e+00> : vector<2x128xf32>
    %21 = tpu.matmul %18, %20, %cst_27 {dimension_numbers = #tpu.dot_dimension_numbers<[1], [0], [0], [1], [0, 0, 1, 1], [], []>} : vector<2x128xf32>, vector<128x128xf32>, vector<2x128xf32> -> vector<2x128xf32>
    %22 = vector.extract_strided_slice %21 {offsets = [0, 0], sizes = [2, 4], strides = [1, 1]} : vector<2x128xf32> to vector<2x4xf32>
    %23 = vector.broadcast %19 : vector<1x4xf32> to vector<2x4xf32>
    %24 = arith.addf %22, %23 : vector<2x4xf32>
    %25 = arith.mulf %24, %2 : vector<2x4xf32>
    %cst_28 = arith.constant dense<0xFF800000> : vector<2xf32>
    %26 = vector.multi_reduction <maximumf>, %25, %cst_28 [1] : vector<2x4xf32> to vector<2xf32>
    %27 = vector.shape_cast %26 : vector<2xf32> to vector<2x1xf32>
    %28 = vector.broadcast %27 : vector<2x1xf32> to vector<2x4xf32>
    %29 = arith.subf %25, %28 : vector<2x4xf32>
    %30 = math.exp %29 : vector<2x4xf32>
    %cst_29 = arith.constant dense<0.000000e+00> : vector<2xf32>
    %31 = vector.multi_reduction <add>, %30, %cst_29 [1] : vector<2x4xf32> to vector<2xf32>
    %32 = vector.shape_cast %31 : vector<2xf32> to vector<2x1xf32>
    %33 = vector.broadcast %32 : vector<2x1xf32> to vector<2x4xf32>
    %34 = arith.divf %30, %33 : vector<2x4xf32>
    %cst_30 = arith.constant 0.000000e+00 : f32
    %35 = vector.broadcast %cst_30 : f32 to vector<2x4xf32>
    %36 = tpu.concatenate %34, %35 in 1 : vector<2x4xf32>, vector<2x4xf32> -> vector<2x8xf32>
    %c128_31 = arith.constant 128 : index
    %c0_32 = arith.constant 0 : index
    %37 = vector.load %arg8[%c128_31, %c0_32] : memref<264x128xf32, #tpu.memory_space<vmem>>, vector<8x128xf32>
    %cst_33 = arith.constant dense<0.000000e+00> : vector<2x128xf32>
    %38 = tpu.matmul %36, %37, %cst_33 {dimension_numbers = #tpu.dot_dimension_numbers<[1], [0], [0], [1], [0, 0, 1, 1], [], []>} : vector<2x8xf32>, vector<8x128xf32>, vector<2x128xf32> -> vector<2x128xf32>
    %39 = arith.mulf %1, %38 : vector<2x128xf32>
    %c136 = arith.constant 136 : index
    %c0_34 = arith.constant 0 : index
    %40 = vector.load %arg8[%c136, %c0_34] : memref<264x128xf32, #tpu.memory_space<vmem>>, vector<128x32xf32>
    %cst_35 = arith.constant dense<0.000000e+00> : vector<2x32xf32>
    %41 = tpu.matmul %39, %40, %cst_35 {dimension_numbers = #tpu.dot_dimension_numbers<[1], [0], [0], [1], [0, 0, 1, 1], [], []>} : vector<2x128xf32>, vector<128x32xf32>, vector<2x32xf32> -> vector<2x32xf32>
    %42 = arith.divf %34, %3 : vector<2x4xf32>
    %43 = arith.subf %2, %42 : vector<2x4xf32>
    %c0_36 = arith.constant 0 : index
    %c0_37 = arith.constant 0 : index
    %44 = vector.load %arg10[%c0_36, %c0_37] : memref<3x128xf32, #tpu.memory_space<vmem>>, vector<1x128xf32>
    %c1_38 = arith.constant 1 : index
    %c0_39 = arith.constant 0 : index
    %45 = vector.load %arg10[%c1_38, %c0_39] : memref<3x128xf32, #tpu.memory_space<vmem>>, vector<1x128xf32>
    %c0_40 = arith.constant 0 : index
    %c0_41 = arith.constant 0 : index
    %46 = vector.load %arg9[%c0_40, %c0_41] : memref<160x128xf32, #tpu.memory_space<vmem>>, vector<32x128xf32>
    %cst_42 = arith.constant dense<0.000000e+00> : vector<2x128xf32>
    %47 = tpu.matmul %4, %46, %cst_42 {dimension_numbers = #tpu.dot_dimension_numbers<[1], [0], [0], [1], [0, 0, 1, 1], [], []>} : vector<2x32xf32>, vector<32x128xf32>, vector<2x128xf32> -> vector<2x128xf32>
    %c32 = arith.constant 32 : index
    %c0_43 = arith.constant 0 : index
    %48 = vector.load %arg9[%c32, %c0_43] : memref<160x128xf32, #tpu.memory_space<vmem>>, vector<32x128xf32>
    %cst_44 = arith.constant dense<0.000000e+00> : vector<2x128xf32>
    %49 = tpu.matmul %41, %48, %cst_44 {dimension_numbers = #tpu.dot_dimension_numbers<[1], [0], [0], [1], [0, 0, 1, 1], [], []>} : vector<2x32xf32>, vector<32x128xf32>, vector<2x128xf32> -> vector<2x128xf32>
    %50 = arith.addf %47, %49 : vector<2x128xf32>
    %c64 = arith.constant 64 : index
    %c0_45 = arith.constant 0 : index
    %51 = vector.load %arg9[%c64, %c0_45] : memref<160x128xf32, #tpu.memory_space<vmem>>, vector<32x128xf32>
    %cst_46 = arith.constant dense<0.000000e+00> : vector<2x128xf32>
    %52 = tpu.matmul %6, %51, %cst_46 {dimension_numbers = #tpu.dot_dimension_numbers<[1], [0], [0], [1], [0, 0, 1, 1], [], []>} : vector<2x32xf32>, vector<32x128xf32>, vector<2x128xf32> -> vector<2x128xf32>
    %53 = arith.addf %50, %52 : vector<2x128xf32>
    %54 = vector.broadcast %44 : vector<1x128xf32> to vector<2x128xf32>
    %55 = arith.addf %53, %54 : vector<2x128xf32>
    %56 = vector.extract_strided_slice %55 {offsets = [0, 0], sizes = [2, 32], strides = [1, 1]} : vector<2x128xf32> to vector<2x32xf32>
    %57 = arith.negf %56 : vector<2x32xf32>
    %58 = math.exp %57 : vector<2x32xf32>
    %cst_47 = arith.constant 1.000000e+00 : f32
    %59 = vector.broadcast %cst_47 : f32 to vector<2x32xf32>
    %60 = arith.addf %59, %58 : vector<2x32xf32>
    %61 = arith.divf %59, %60 : vector<2x32xf32>
    %62 = vector.extract_strided_slice %55 {offsets = [0, 32], sizes = [2, 32], strides = [1, 1]} : vector<2x128xf32> to vector<2x32xf32>
    %63 = arith.negf %62 : vector<2x32xf32>
    %64 = math.exp %63 : vector<2x32xf32>
    %cst_48 = arith.constant 1.000000e+00 : f32
    %65 = vector.broadcast %cst_48 : f32 to vector<2x32xf32>
    %66 = arith.addf %65, %64 : vector<2x32xf32>
    %67 = arith.divf %65, %66 : vector<2x32xf32>
    %68 = vector.extract_strided_slice %55 {offsets = [0, 64], sizes = [2, 32], strides = [1, 1]} : vector<2x128xf32> to vector<2x32xf32>
    %69 = math.tanh %68 : vector<2x32xf32>
    %70 = vector.extract_strided_slice %55 {offsets = [0, 96], sizes = [2, 32], strides = [1, 1]} : vector<2x128xf32> to vector<2x32xf32>
    %71 = arith.negf %70 : vector<2x32xf32>
    %72 = math.exp %71 : vector<2x32xf32>
    %cst_49 = arith.constant 1.000000e+00 : f32
    %73 = vector.broadcast %cst_49 : f32 to vector<2x32xf32>
    %74 = arith.addf %73, %72 : vector<2x32xf32>
    %75 = arith.divf %73, %74 : vector<2x32xf32>
    %76 = arith.mulf %67, %10 : vector<2x32xf32>
    %77 = arith.mulf %61, %69 : vector<2x32xf32>
    %78 = arith.addf %76, %77 : vector<2x32xf32>
    %79 = math.tanh %78 : vector<2x32xf32>
    %80 = arith.mulf %75, %79 : vector<2x32xf32>
    %c96 = arith.constant 96 : index
    %c0_50 = arith.constant 0 : index
    %81 = vector.load %arg9[%c96, %c0_50] : memref<160x128xf32, #tpu.memory_space<vmem>>, vector<32x128xf32>
    %cst_51 = arith.constant dense<0.000000e+00> : vector<2x128xf32>
    %82 = tpu.matmul %80, %81, %cst_51 {dimension_numbers = #tpu.dot_dimension_numbers<[1], [0], [0], [1], [0, 0, 1, 1], [], []>} : vector<2x32xf32>, vector<32x128xf32>, vector<2x128xf32> -> vector<2x128xf32>
    %c128_52 = arith.constant 128 : index
    %c0_53 = arith.constant 0 : index
    %83 = vector.load %arg9[%c128_52, %c0_53] : memref<160x128xf32, #tpu.memory_space<vmem>>, vector<32x128xf32>
    %cst_54 = arith.constant dense<0.000000e+00> : vector<2x128xf32>
    %84 = tpu.matmul %8, %83, %cst_54 {dimension_numbers = #tpu.dot_dimension_numbers<[1], [0], [0], [1], [0, 0, 1, 1], [], []>} : vector<2x32xf32>, vector<32x128xf32>, vector<2x128xf32> -> vector<2x128xf32>
    %85 = arith.addf %82, %84 : vector<2x128xf32>
    %86 = vector.broadcast %45 : vector<1x128xf32> to vector<2x128xf32>
    %87 = arith.addf %85, %86 : vector<2x128xf32>
    %88 = vector.extract_strided_slice %87 {offsets = [0, 0], sizes = [2, 32], strides = [1, 1]} : vector<2x128xf32> to vector<2x32xf32>
    %89 = arith.negf %88 : vector<2x32xf32>
    %90 = math.exp %89 : vector<2x32xf32>
    %cst_55 = arith.constant 1.000000e+00 : f32
    %91 = vector.broadcast %cst_55 : f32 to vector<2x32xf32>
    %92 = arith.addf %91, %90 : vector<2x32xf32>
    %93 = arith.divf %91, %92 : vector<2x32xf32>
    %94 = vector.extract_strided_slice %87 {offsets = [0, 32], sizes = [2, 32], strides = [1, 1]} : vector<2x128xf32> to vector<2x32xf32>
    %95 = arith.negf %94 : vector<2x32xf32>
    %96 = math.exp %95 : vector<2x32xf32>
    %cst_56 = arith.constant 1.000000e+00 : f32
    %97 = vector.broadcast %cst_56 : f32 to vector<2x32xf32>
    %98 = arith.addf %97, %96 : vector<2x32xf32>
    %99 = arith.divf %97, %98 : vector<2x32xf32>
    %100 = vector.extract_strided_slice %87 {offsets = [0, 64], sizes = [2, 32], strides = [1, 1]} : vector<2x128xf32> to vector<2x32xf32>
    %101 = math.tanh %100 : vector<2x32xf32>
    %102 = vector.extract_strided_slice %87 {offsets = [0, 96], sizes = [2, 32], strides = [1, 1]} : vector<2x128xf32> to vector<2x32xf32>
    %103 = arith.negf %102 : vector<2x32xf32>
    %104 = math.exp %103 : vector<2x32xf32>
    %cst_57 = arith.constant 1.000000e+00 : f32
    %105 = vector.broadcast %cst_57 : f32 to vector<2x32xf32>
    %106 = arith.addf %105, %104 : vector<2x32xf32>
    %107 = arith.divf %105, %106 : vector<2x32xf32>
    %108 = arith.mulf %99, %12 : vector<2x32xf32>
    %109 = arith.mulf %93, %101 : vector<2x32xf32>
    %110 = arith.addf %108, %109 : vector<2x32xf32>
    %111 = math.tanh %110 : vector<2x32xf32>
    %112 = arith.mulf %107, %111 : vector<2x32xf32>
    %113 = tpu.concatenate %80, %112, %78, %110 in 1 : vector<2x32xf32>, vector<2x32xf32>, vector<2x32xf32>, vector<2x32xf32> -> vector<2x128xf32>
    %c0_58 = arith.constant 0 : index
    %c0_59 = arith.constant 0 : index
    %114 = vector.load %arg11[%c0_58, %c0_59] : memref<2x128xf32, #tpu.memory_space<vmem>>, vector<2x128xf32>
    tpu.vector_store %arg11[%c0_58, %c0_59], %113 {strides = array<i32>} : memref<2x128xf32, #tpu.memory_space<vmem>>, vector<2x128xf32>,
    %115 = tpu.concatenate %34, %43 in 1 : vector<2x4xf32>, vector<2x4xf32> -> vector<2x8xf32>
    %c0_60 = arith.constant 0 : index
    %c0_61 = arith.constant 0 : index
    %116 = vector.load %arg12[%c0_60, %c0_61] : memref<2x8xf32, #tpu.memory_space<vmem>>, vector<2x8xf32>
    tpu.vector_store %arg12[%c0_60, %c0_61], %115 {strides = array<i32>} : memref<2x8xf32, #tpu.memory_space<vmem>>, vector<2x8xf32>,
    return
  }
}

</mosaic_0001>

<bundles_post_ra>
// kernel: attention_decoder.1
= control target key start
LH: loop header
LB: loop body
LE: loop exit
PB: predicated region body
PF: predicated region fallthrough
CT: control target
= control target key end

     0   :  { %18 = vsyncpa [#allocation3], 0  ;;  %s1770_s0 = inlined_call_operand.vmem [shape: f32[2,32], index: 0, kind: input, shape index: {}]   ;;  %s1771_s1 = inlined_call_operand.vmem [shape: f32[2,128], index: 1, kind: input, shape index: {}]   ;;  %s1772_s2 = inlined_call_operand.vmem [shape: f32[2,4], index: 2, kind: input, shape index: {}]   ;;  %s1773_s3 = inlined_call_operand.vmem [shape: f32[2,4], index: 3, kind: input, shape index: {}]   ;;  %s1774_s4 = inlined_call_operand.vmem [shape: f32[2,32], index: 4, kind: input, shape index: {}]   ;;  %s1775_s5 = inlined_call_operand.vmem [shape: f32[2,2,32], index: 5, kind: input, shape index: {}]   ;;  %s1776_s6 = inlined_call_operand.vmem [shape: f32[2,2,32], index: 6, kind: input, shape index: {}]   ;;  %s1777_s7 = inlined_call_operand.hbm [shape: f32[160,128], index: 7, kind: input, shape index: {}]   ;;  %s1778_s8 = inlined_call_operand.hbm [shape: f32[264,128], index: 8, kind: input, shape index: {}]   ;;  %s1779_s9 = inlined_call_operand.hbm [shape: f32[160,128], index: 9, kind: input, shape index: {}]   ;;  %s1780_s10 = inlined_call_operand.vmem [shape: f32[3,128], index: 10, kind: input, shape index: {}]   ;;  %s1781_s11 = inlined_call_operand.vmem [shape: f32[2,128], index: 11, kind: output, shape index: {0}]   ;;  %s1782_s12 = inlined_call_operand.vmem [shape: f32[2,8], index: 12, kind: output, shape index: {1}]  }
   0x1   :  { %19 = vsyncpa [#allocation5], 0  ;;  %s1509_s21 = smov [#allocation4]   ;;  %s1510_s23 = smov [#allocation2]  }
   0x2   :  { %s51_s22 = sshll.u32 %s1509_s21, 4  ;;  %s39_s24 = sshll.u32 %s1510_s23, 4  ;;  %s52_s22 = int_to_ptr.vmem [resolvable:$true] %s51_s22  ;;  %s1585_s24 = int_to_ptr.vmem [resolvable:$true] %s39_s24 }
   0x3   :  { %s1439_s27 = scalar_lea.hbm %s1778_s8, 4224 }
   0x4   :  { %p1440_p0 = scmp.ne.s32.totalorder %s1778_s8, %s1439_s27  ;;  %p1443_p1 = scmp.lt.u32.totalorder %s1439_s27, %s1778_s8 }
   0x6   :  { %p1445_p2 = pnand %p1443_p1, %p1440_p0 }
   0x8   :  { %1448 = shalt.err (!%p1445_p2)
}
   0x9   :  { %s1449_s14 = scalar_lea.vmem %s52_s22, 4224  ;;  %p1454_p4 = scmp.lt.s32.totalorder %s52_s22, %s52_s22 }
   0xa   :  { %p1450_p3 = scmp.ne.s32.totalorder %s52_s22, %s1449_s14  ;;  %p1455_p5 = scmp.lt.s32.totalorder %s1449_s14, %s1449_s14 }
   0xc   :  { %p1456_p6 = por %p1455_p5, %p1454_p4 }
   0xe   :  { %p1457_p7 = pnand %p1456_p6, %p1450_p3 }
  0x10   :  { %1460 = shalt.err (!%p1457_p7)
}
  0x11   :  { %s1511_s15 = smov 128   ;;  %s1512_s16 = smov 8  }
  0x12   :  { %57 = dma.hbm_to_vmem [thread:$0]  %s1778_s8, 4224, %s52_s22, [#allocation5], %s1511_s15, %s1511_s15, %s1512_s16  }
  0x13   :  { %s1461_s21 = scalar_lea.hbm %s1777_s7, 2560 }
  0x14   :  { %p1462_p8 = scmp.ne.s32.totalorder %s1777_s7, %s1461_s21  ;;  %p1465_p9 = scmp.lt.u32.totalorder %s1461_s21, %s1777_s7 }
  0x16   :  { %p1467_p10 = pnand %p1465_p9, %p1462_p8 }
  0x18   :  { %1470 = shalt.err (!%p1467_p10)
}
  0x19   :  { %s1471_s28 = scalar_lea.vmem %s1585_s24, 2560  ;;  %p1476_p12 = scmp.lt.s32.totalorder %s1585_s24, %s1585_s24 }
  0x1a   :  { %p1472_p11 = scmp.ne.s32.totalorder %s1585_s24, %s1471_s28  ;;  %p1477_p13 = scmp.lt.s32.totalorder %s1471_s28, %s1471_s28 }
  0x1c   :  { %p1478_p0 = por %p1477_p13, %p1476_p12 }
  0x1e   :  { %p1479_p1 = pnand %p1478_p0, %p1472_p11 }
  0x20   :  { %1482 = shalt.err (!%p1479_p1)
}
  0x21   :  { %45 = dma.hbm_to_vmem [thread:$0]  %s1777_s7, 2560, %s1585_s24, [#allocation3], %s1511_s15, %s1511_s15, %s1512_s16  }
  0x22   :  { %s1513_s29 = smov [#allocation6]   ;;  %s1483_s17 = scalar_lea.hbm %s1779_s9, 2560 }
  0x23   :  { %s63_s30 = sshll.u32 %s1513_s29, 4  ;;  %p1484_p2 = scmp.ne.s32.totalorder %s1779_s9, %s1483_s17  ;;  %s64_s30 = int_to_ptr.vmem [resolvable:$true] %s63_s30 }
  0x24   :  { %p1487_p3 = scmp.lt.u32.totalorder %s1483_s17, %s1779_s9 }
  0x26   :  { %p1489_p4 = pnand %p1487_p3, %p1484_p2 }
  0x28   :  { %1492 = shalt.err (!%p1489_p4)
}
  0x29   :  { %s1493_s23 = scalar_lea.vmem %s64_s30, 2560  ;;  %p1498_p6 = scmp.lt.s32.totalorder %s64_s30, %s64_s30 }
  0x2a   :  { %p1494_p5 = scmp.ne.s32.totalorder %s64_s30, %s1493_s23  ;;  %p1499_p7 = scmp.lt.s32.totalorder %s1493_s23, %s1493_s23 }
  0x2c   :  { %p1500_p8 = por %p1499_p7, %p1498_p6 }
  0x2e   :  { %p1501_p9 = pnand %p1500_p8, %p1494_p5 }
  0x30   :  { %1504 = shalt.err (!%p1501_p9)
}
  0x31   :  { %69 = dma.hbm_to_vmem [thread:$0]  %s1779_s9, 2560, %s64_s30, [#allocation5], %s1511_s15, %s1511_s15, %s1512_s16  }
  0x32   :  { %1505 = dma.done.wait [#allocation3], 2560  }
  0x33   :  { %1506 = vsyncadd [#allocation3], 4294964736 }
  0x34   :  { %1507 = dma.done.wait [#allocation5], 6784  }
  0x35   :  { %1508 = vsyncadd [#allocation5], 4294960512  ;;  %v1514_v0 = vmov 0.0|0.0   ;;  %vm1515_vm0 = vmmov 0   ;;  %v1516_v1 = vmov 0.0   ;;  %v92_v2 = vld [vmem:[#allocation2] sm:$0xff] }
  0x36   :  { %1294 = vmatprep.subr.bf16.mxu0 %v1514_v0  ;;  %1150 = vmatprep.mubr.msk.f32.mxu0 %vm1515_vm0, %v1516_v1  ;;  %v93_v3 = vld [vmem:[#allocation2 + $0x8] sm:$0xff]  ;;  %v94_v4 = vld [vmem:[#allocation2 + $0x10] sm:$0xff]  ;;  %v95_v6 = vld [vmem:[#allocation2 + $0x18] sm:$0xff]  ;;  %vm182_vm1 = vcmask 261120   ;;  %vm350_vm2 = vcmask 25600   ;;  %vm362_vm3 = vcmask 31744  }
  0x37   :  { %1324 = vmatprep.subr.bf16.mxu1 %v1514_v0  ;;  %1196 = vmatprep.mubr.msk.f32.mxu1 %vm1515_vm0, %v1516_v1  ;;  %v1295_v5 = vpack.c.bf16 %v93_v3, %v92_v2  ;;  %v1298_v7 = vpack.c.bf16 %v95_v6, %v94_v4  ;;  %v96_v8 = vld [vmem:[#allocation2 + $0x20] sm:$0xff]  ;;  %v97_v9 = vld [vmem:[#allocation2 + $0x28] sm:$0xff]  ;;  %v98_v11 = vld [vmem:[#allocation2 + $0x30] sm:$0xff]  ;;  %vm365_vm4 = vcmask 64512   ;;  %s1517_s30 = smov 64   ;;  %s1518_s17 = smov 32  }
  0x38   :  { %v1301_v10 = vpack.c.bf16 %v97_v9, %v96_v8  ;;  %v258_v12 = vld [vmem:[#allocation4] sm:$0xff]  ;;  %v259_v13 = vld [vmem:[#allocation4 + $0x8] sm:$0xff]  ;;  %v99_v14 = vld [vmem:[#allocation2 + $0x38] sm:$0xff]  ;;  %vm1009_vm5 = vcmask 58368   ;;  %vm999_vm6 = vcmask 523264   ;;  %vm1001_vm7 = vcmask 785408  }
  0x39   :  { %1296 = vmatpush3.bf16.msra.mxu0 %v1295_v5  ;;  %v1325_v15 = vpack.c.bf16 %v259_v13, %v258_v12  ;;  %v260_v16 = vld [vmem:[#allocation4 + $0x10] sm:$0xff]  ;;  %v261_v17 = vld [vmem:[#allocation4 + $0x18] sm:$0xff]  ;;  %v1304_v19 = vpack.c.bf16 %v99_v14, %v98_v11  ;;  %v262_v20 = vld [vmem:[#allocation4 + $0x20] sm:$0xff] }
  0x3a   :  { %1297 = vmatprep.subr.bf16.mxu0 %v1514_v0  ;;  %v1328_v18 = vpack.c.bf16 %v261_v17, %v260_v16  ;;  %v263_v21 = vld [vmem:[#allocation4 + $0x28] sm:$0xff]  ;;  %v100_v22 = vld [vmem:[#allocation2 + $0x40] sm:$0xff]  ;;  %v264_v26 = vld [vmem:[#allocation4 + $0x30] sm:$0xff] }
  0x3b   :  { %1326 = vmatpush3.bf16.msra.mxu1 %v1325_v15  ;;  %v101_v23 = vld [vmem:[#allocation2 + $0x48] sm:$0xff]  ;;  %v1331_v24 = vpack.c.bf16 %v263_v21, %v262_v20  ;;  %v265_v27 = vld [vmem:[#allocation4 + $0x38] sm:$0xff]  ;;  %v102_v28 = vld [vmem:[#allocation2 + $0x50] sm:$0xff] }
  0x3c   :  { %1327 = vmatprep.subr.bf16.mxu1 %v1514_v0  ;;  %v1307_v25 = vpack.c.bf16 %v101_v23, %v100_v22  ;;  %v103_v29 = vld [vmem:[#allocation2 + $0x58] sm:$0xff]  ;;  %v1334_v30 = vpack.c.bf16 %v265_v27, %v264_v26  ;;  %v266_v32 = vld [vmem:[#allocation4 + $0x40] sm:$0xff]  ;;  %v267_v33 = vld [vmem:[#allocation4 + $0x48] sm:$0xff] }
  0x3d   :  { %1299 = vmatpush3.bf16.msra.mxu0 %v1298_v7  ;;  %v1310_v31 = vpack.c.bf16 %v103_v29, %v102_v28  ;;  %v104_v34 = vld [vmem:[#allocation2 + $0x60] sm:$0xff]  ;;  %v105_v35 = vld [vmem:[#allocation2 + $0x68] sm:$0xff]  ;;  %v1337_v36 = vpack.c.bf16 %v267_v33, %v266_v32  ;;  %v106_v38 = vld [vmem:[#allocation2 + $0x70] sm:$0xff] }
  0x3e   :  { %1300 = vmatprep.subr.bf16.mxu0 %v1514_v0  ;;  %v1313_v37 = vpack.c.bf16 %v105_v35, %v104_v34  ;;  %v107_v39 = vld [vmem:[#allocation2 + $0x78] sm:$0xff]  ;;  %v178_v41 = vld [vmem:[#allocation2 + $0x80] sm:$0xff]  ;;  %v179_v42 = vld [vmem:[#allocation2 + $0x88] sm:$0xff] }
  0x3f   :  { %1329 = vmatpush3.bf16.msra.mxu1 %v1328_v18  ;;  %v1316_v40 = vpack.c.bf16 %v107_v39, %v106_v38  ;;  %v1658_v43 = vld [vmem:[%s1771_s1] sm:$0x3]  ;;  %v1319_v44 = vpack.c.bf16 %v179_v42, %v178_v41  ;;  %v180_v45 = vld [vmem:[#allocation2 + $0x90] sm:$0xff]  ;;  %v181_v46 = vld [vmem:[#allocation2 + $0x98] sm:$0xff] }
  0x40   :  { %1330 = vmatprep.subr.bf16.mxu1 %v1514_v0  ;;  %v1322_v47 = vpack.c.bf16 %v181_v46, %v180_v45  ;;  %v81_v48 = vld [vmem:[%s1770_s0] sm:$0x3]  ;;  %v268_v49 = vld [vmem:[#allocation4 + $0x50] sm:$0xff]  ;;  %v269_v50 = vld [vmem:[#allocation4 + $0x58] sm:$0xff] }
  0x41   :  { %1302 = vmatpush3.bf16.msra.mxu0 %v1301_v10  ;;  %v1340_v51 = vpack.c.bf16 %v269_v50, %v268_v49  ;;  %v270_v52 = vld [vmem:[#allocation4 + $0x60] sm:$0xff]  ;;  %v271_v53 = vld [vmem:[#allocation4 + $0x68] sm:$0xff]  ;;  %v272_v55 = vld [vmem:[#allocation4 + $0x70] sm:$0xff] }
  0x42   :  { %1303 = vmatprep.subr.bf16.mxu0 %v1514_v0  ;;  %v1343_v54 = vpack.c.bf16 %v271_v53, %v270_v52  ;;  %v273_v56 = vld [vmem:[#allocation4 + $0x78] sm:$0xff]  ;;  %v1024_v61 = vld [vmem:[%s1780_s10 + $0x2] ss:$0 sm:$0xff]  ;;  %v1683_v63 = vld [vmem:[%s1772_s2] sm:$0x3] }
  0x43   :  { %1332 = vmatpush3.bf16.msra.mxu1 %v1331_v24  ;;  %v1346_v57 = vpack.c.bf16 %v273_v56, %v272_v55  ;;  %v364_v11 = vld [vmem:[#allocation4 + $0x80] sm:$0xff]  ;;  %v440_v13 = vld [vmem:[#allocation4 + $0x88] sm:$0xff]  ;;  %v441_v14 = vld [vmem:[#allocation4 + $0x90] sm:$0xff] }
  0x44   :  { %1333 = vmatprep.subr.bf16.mxu1 %v1514_v0  ;;  %v1349_v17 = vpack.c.bf16 %v441_v14, %v440_v13  ;;  %v442_v18 = vld [vmem:[#allocation4 + $0x98] sm:$0xff]  ;;  %v444_v22 = vld [vmem:[#allocation4 + $0xa8] sm:$0xff]  ;;  %v445_v23 = vld [vmem:[#allocation4 + $0xb0] sm:$0xff] }
  0x45   :  { %1305 = vmatpush3.bf16.msra.mxu0 %v1304_v19  ;;  %v443_v19 = vld [vmem:[#allocation4 + $0xa0] sm:$0xff]  ;;  %v1355_v24 = vpack.c.bf16 %v445_v23, %v444_v22  ;;  %v448_v28 = vld [vmem:[#allocation4 + $0xc8] sm:$0xff]  ;;  %v449_v29 = vld [vmem:[#allocation4 + $0xd0] sm:$0xff] }
  0x46   :  { %1306 = vmatprep.subr.bf16.mxu0 %v1514_v0  ;;  %v1352_v21 = vpack.c.bf16 %v443_v19, %v442_v18  ;;  %v447_v26 = vld [vmem:[#allocation4 + $0xc0] sm:$0xff]  ;;  %v452_v34 = vld [vmem:[#allocation4 + $0xe8] sm:$0xff]  ;;  %v453_v35 = vld [vmem:[#allocation4 + $0xf0] sm:$0xff] }
  0x47   :  { %1335 = vmatpush3.bf16.msra.mxu1 %v1334_v30  ;;  %v1361_v30 = vpack.c.bf16 %v449_v29, %v448_v28  ;;  %v451_v32 = vld [vmem:[#allocation4 + $0xe0] sm:$0xff]  ;;  %v536_v41 = vld [vmem:[#allocation6 + $0x28] sm:$0xff]  ;;  %v537_v42 = vld [vmem:[#allocation6 + $0x30] sm:$0xff] }
  0x48   :  { %1336 = vmatprep.subr.bf16.mxu1 %v1514_v0  ;;  %v455_v38 = vld [vmem:[#allocation4 + $0x100] sm:$0xff]  ;;  %v531_v50 = vld [vmem:[#allocation6] sm:$0xff]  ;;  %v533_v53 = vld [vmem:[#allocation6 + $0x10] sm:$0xff] }
  0x49   :  { %1308 = vmatpush3.bf16.msra.mxu0 %v1307_v25  ;;  %v446_v25 = vld [vmem:[#allocation4 + $0xb8] sm:$0xff]  ;;  %v538_v45 = vld [vmem:[#allocation6 + $0x38] sm:$0xff]  ;;  %v796_v28 = vld [vmem:[#allocation6 + $0x60] sm:$0xff] }
  0x4a   :  { %1309 = vmatprep.subr.bf16.mxu0 %v1514_v0  ;;  %v1358_v27 = vpack.c.bf16 %v447_v26, %v446_v25  ;;  %v1376_v46 = vpack.c.bf16 %v538_v45, %v537_v42  ;;  %v800_v26 = vld [vmem:[#allocation6 + $0x80] sm:$0xff]  ;;  %v1033_v45 = vld [vmem:[%s1780_s10 + $0x1] ss:$0 sm:$0xff] }
  0x4b   :  { %1338 = vmatpush3.bf16.msra.mxu1 %v1337_v36  ;;  %v1367_v36 = vpack.c.bf16 %v453_v35, %v452_v34  ;;  %v798_v34 = vld [vmem:[#allocation6 + $0x70] sm:$0xff]  ;;  %v799_v35 = vld [vmem:[#allocation6 + $0x78] sm:$0xff] }
  0x4c   :  { %1339 = vmatprep.subr.bf16.mxu1 %v1514_v0 }
  0x4d   :  { %1311 = vmatpush3.bf16.msra.mxu0 %v1310_v31  ;;  %v450_v31 = vld [vmem:[#allocation4 + $0xd8] sm:$0xff] }
  0x4e   :  { %1312 = vmatprep.subr.bf16.mxu0 %v1514_v0  ;;  %v1364_v33 = vpack.c.bf16 %v451_v32, %v450_v31  ;;  %v802_v31 = vld [vmem:[#allocation6 + $0x90] sm:$0xff]  ;;  %v803_v32 = vld [vmem:[#allocation6 + $0x98] sm:$0xff] }
  0x4f   :  { %1341 = vmatpush3.bf16.msra.mxu1 %v1340_v51  ;;  %v532_v51 = vld [vmem:[#allocation6 + $0x8] sm:$0xff] }
  0x50   :  { %1342 = vmatprep.subr.bf16.mxu1 %v1514_v0  ;;  %v1379_v52 = vpack.c.bf16 %v532_v51, %v531_v50  ;;  %v1022_v51 = vld [vmem:[%s1776_s6 + $0x2] sm:$0x3] }
  0x51   :  { %1314 = vmatpush3.bf16.msra.mxu0 %v1313_v37  ;;  %v454_v37 = vld [vmem:[#allocation4 + $0xf8] sm:$0xff] }
  0x52   :  { %1315 = vmatprep.subr.bf16.mxu0 %v1514_v0  ;;  %v1370_v39 = vpack.c.bf16 %v455_v38, %v454_v37  ;;  %v1400_v37 = vpack.c.bf16 %v799_v35, %v798_v34 }
  0x53   :  { %1344 = vmatpush3.bf16.msra.mxu1 %v1343_v54  ;;  %v534_v54 = vld [vmem:[#allocation6 + $0x18] sm:$0xff] }
  0x54   :  { %1345 = vmatprep.subr.bf16.mxu1 %v1514_v0 }
  0x55   :  { %1317 = vmatpush3.bf16.msra.mxu0 %v1316_v40  ;;  %v535_v40 = vld [vmem:[#allocation6 + $0x20] sm:$0xff] }
  0x56   :  { %1318 = vmatprep.subr.bf16.mxu0 %v1514_v0 }
  0x57   :  { %1347 = vmatpush3.bf16.msra.mxu1 %v1346_v57  ;;  %v1382_v57 = vpack.c.bf16 %v534_v54, %v533_v53 }
  0x58   :  { %1151 = vmatmul.mubr.f32.vlgmr.msra.gmra.mrb[0].mxu0 %v1658_v43  ;;  %1199 = vmatprep.subr.mxu1 %v1516_v1 }
  0x59   :  { %1320 = vmatpush3.bf16.msra.mxu0 %v1319_v44  ;;  %1161 = vmatprep.mubr.msk.f32.mxu0 %vm1515_vm0, %v1516_v1  ;;  %v1373_v44 = vpack.c.bf16 %v536_v41, %v535_v40 }
  0x5a   :  { %1321 = vmatprep.subr.bf16.mxu0 %v1514_v0 }
  0x5d   :  { %1323 = vmatpush3.bf16.msra.mxu0 %v1322_v47 }
  0x5e   :  { %1372 = vmatprep.subr.bf16.mxu0 %v1514_v0 }
  0x60   :  { %1162 = vmatmul.mubr.msk.f32.vlgmr.msra.gmra.mrb[0].mxu0 %vm182_vm1, %v81_v48 }
  0x61   :  { %1247 = vmatprep.mubr.msk.f32.mxu0 %vm1515_vm0, %v1516_v1  ;;  %1374 = vmatpush3.bf16.msra.mxu0 %v1373_v44 }
  0x62   :  { %1375 = vmatprep.subr.bf16.mxu0 %v1514_v0 }
  0x65   :  { %1377 = vmatpush3.bf16.msra.mxu0 %v1376_v46 }
  0x66   :  { %1378 = vmatprep.subr.bf16.mxu0 %v1514_v0 }
 0x133   :  { %v252_v58 = vpop.f32.mrb[0].mxu0 }
 0x134   :  { %1415 = vtanh.f32 %v252_v58  ;;  %v1163_v59 = vpop.f32.mrb[1].mxu0  ;;  %v686_v58 = vld [vmem:[#allocation6 + $0x48] sm:$0xff] }
 0x135   :  { %v85_v59 = vld [vmem:[%s1774_s4] sm:$0x3] }
 0x13e   :  { %v1416_v60 = vpop.eup %1415 }
 0x13f   :  { %1197 = vmatmul.mubr.f32.vlgmr.msra.gmra.mrb[0].mxu1 %v1416_v60 }
 0x140   :  { %1201 = vmatprep.mubr.msk.f32.mxu1 %vm1515_vm0, %v1516_v1  ;;  %1200 = vmatpush3.msra.mxu1 %v364_v11 }
 0x141   :  { %1348 = vmatprep.subr.bf16.mxu1 %v1514_v0 }
 0x212   :  { %v340_v62 = vpop.f32.mrb[0].mxu1 }
 0x213   :  { %v348_v2 = vadd.f32 %v1024_v61, %v340_v62  ;;  %v1198_v3 = vpop.f32.mrb[1].mxu1  ;;  %v687_v61 = vld [vmem:[#allocation6 + $0x50] sm:$0xff]  ;;  %v688_v62 = vld [vmem:[#allocation6 + $0x58] sm:$0xff] }
 0x214   :  { %v86_v3 = vld [vmem:[%s1775_s5] sm:$0x3] }
 0x215   :  { %v349_v4 = vmul.f32 %v348_v2, %v1683_v63  ;;  %v1388_v2 = vpack.c.bf16 %v688_v62, %v687_v61 }
 0x217   :  { %v351_v5 = vsel %vm350_vm2, %v349_v4, -inf }
 0x218   :  { %352 = vmax.xlane.f32.xlu0 %v351_v5 }
 0x2a5   :  { %v353_v6 = vpop.xlane.xlu0 %352 }
 0x2a6   :  { %v354_v7 = vsub.f32 %v349_v4, %v353_v6 }
 0x2a8   :  { %v355_v8 = vmul.f32 1.442695, %v354_v7 }
 0x2aa   :  { %1417 = vpow2.f32 %v355_v8 }
 0x2b4   :  { %v1418_v9 = vpop.eup %1417 }
 0x2b5   :  { %v357_v10 = vsel %vm350_vm2, %v1418_v9, 0.0 }
 0x2b6   :  { %358 = vadd.xlane.f32.xlu0 %v357_v10 }
 0x343   :  { %v359_v12 = vpop.xlane.xlu0 %358 }
 0x344   :  { %1419 = vrcp.f32 %v359_v12 }
 0x34e   :  { %v1420_v15 = vpop.eup %1419 }
 0x34f   :  { %v1687_v16 = vmul.f32 %v1420_v15, %v1418_v9  ;;  %v1029_v9 = vld [vmem:[%s1780_s10] ss:$0 sm:$0xff] }
 0x351   :  { %v363_v20 = vsel %vm362_vm3, %v1687_v16, 0.0 }
 0x352   :  { %1202 = vmatmul.mubr.msk.f32.vlgmr.msra.gmra.mrb[2].mxu1 %vm365_vm4, %v363_v20 }
 0x353   :  { %1350 = vmatpush3.bf16.msra.mxu1 %v1349_v17  ;;  %1236 = vmatprep.mubr.msk.f32.mxu1 %vm1515_vm0, %v1516_v1 }
 0x354   :  { %1351 = vmatprep.subr.bf16.mxu1 %v1514_v0 }
 0x357   :  { %1353 = vmatpush3.bf16.msra.mxu1 %v1352_v21 }
 0x358   :  { %1354 = vmatprep.subr.bf16.mxu1 %v1514_v0 }
 0x35b   :  { %1356 = vmatpush3.bf16.msra.mxu1 %v1355_v24 }
 0x35c   :  { %1357 = vmatprep.subr.bf16.mxu1 %v1514_v0 }
 0x35f   :  { %1359 = vmatpush3.bf16.msra.mxu1 %v1358_v27  ;;  %v801_v27 = vld [vmem:[#allocation6 + $0x88] sm:$0xff] }
 0x360   :  { %1360 = vmatprep.subr.bf16.mxu1 %v1514_v0  ;;  %v1391_v29 = vpack.c.bf16 %v801_v27, %v800_v26 }
 0x363   :  { %1362 = vmatpush3.bf16.msra.mxu1 %v1361_v30  ;;  %v797_v30 = vld [vmem:[#allocation6 + $0x68] sm:$0xff] }
 0x364   :  { %1363 = vmatprep.subr.bf16.mxu1 %v1514_v0 }
 0x367   :  { %1365 = vmatpush3.bf16.msra.mxu1 %v1364_v33  ;;  %v1397_v33 = vpack.c.bf16 %v797_v30, %v796_v28 }
 0x368   :  { %1366 = vmatprep.subr.bf16.mxu1 %v1514_v0 }
 0x36b   :  { %1368 = vmatpush3.bf16.msra.mxu1 %v1367_v36  ;;  %v1394_v36 = vpack.c.bf16 %v803_v32, %v802_v31 }
 0x36c   :  { %1369 = vmatprep.subr.bf16.mxu1 %v1514_v0 }
 0x36f   :  { %1371 = vmatpush3.bf16.msra.mxu1 %v1370_v39  ;;  %v1021_v39 = vld [vmem:[%s1775_s5 + $0x2] sm:$0x3] }
 0x370   :  { %1396 = vmatprep.subr.bf16.mxu1 %v1514_v0 }
 0x425   :  { %v435_v47 = vpop.f32.mrb[2].mxu1 }
 0x426   :  { %v439_v48 = vmul.f32 %v435_v47, %v1658_v43  ;;  %v1203_v49 = vpop.f32.mrb[3].mxu1  ;;  %v685_v43 = vld [vmem:[#allocation6 + $0x40] sm:$0xff] }
 0x427   :  { %v1385_v60 = vpack.c.bf16 %v686_v58, %v685_v43 }
 0x428   :  { %1237 = vmatmul.mubr.f32.vlgmr.msra.gmra.mrb[4].mxu1 %v439_v48 }
 0x429   :  { %1291 = vmatprep.mubr.msk.f32.mxu1 %vm1515_vm0, %v1516_v1  ;;  %1398 = vmatpush3.bf16.msra.mxu1 %v1397_v33 }
 0x42a   :  { %1399 = vmatprep.subr.bf16.mxu1 %v1514_v0 }
 0x42d   :  { %1401 = vmatpush3.bf16.msra.mxu1 %v1400_v37 }
 0x4fb   :  { %v522_v55 = vpop.f32.mrb[4].mxu1 }
 0x4fc   :  { %v1238_v56 = vpop.f32.mrb[5].mxu1  ;;  %1248 = vmatmul.mubr.msk.f32.vlgmr.msra.gmra.mrb[2].mxu0 %vm182_vm1, %v522_v55 }
 0x4fd   :  { %1380 = vmatpush3.bf16.msra.mxu0 %v1379_v52  ;;  %1258 = vmatprep.mubr.msk.f32.mxu0 %vm1515_vm0, %v1516_v1 }
 0x4fe   :  { %1381 = vmatprep.subr.bf16.mxu0 %v1514_v0 }
 0x501   :  { %1383 = vmatpush3.bf16.msra.mxu0 %v1382_v57 }
 0x502   :  { %1384 = vmatprep.subr.bf16.mxu0 %v1514_v0 }
 0x504   :  { %1259 = vmatmul.mubr.msk.f32.vlgmr.msra.gmra.mrb[4].mxu0 %vm182_vm1, %v85_v59  ;;  %v84_v59 = vld [vmem:[%s1773_s3] sm:$0x3] }
 0x505   :  { %1386 = vmatpush3.bf16.msra.mxu0 %v1385_v60  ;;  %1269 = vmatprep.mubr.msk.f32.mxu0 %vm1515_vm0, %v1516_v1 }
 0x506   :  { %1387 = vmatprep.subr.bf16.mxu0 %v1514_v0 }
 0x509   :  { %1389 = vmatpush3.bf16.msra.mxu0 %v1388_v2 }
 0x50a   :  { %1390 = vmatprep.subr.bf16.mxu0 %v1514_v0 }
 0x50c   :  { %1270 = vmatmul.mubr.msk.f32.vlgmr.msra.gmra.mrb[6].mxu0 %vm182_vm1, %v86_v3 }
 0x50d   :  { %1280 = vmatprep.mubr.msk.f32.mxu0 %vm1515_vm0, %v1516_v1  ;;  %v89_v1 = vld [vmem:[%s1776_s6] sm:$0x3]  ;;  %1392 = vmatpush3.bf16.msra.mxu0 %v1391_v29  ;;  %s1519_s6 = smov 4  }
 0x50e   :  { %1393 = vmatprep.subr.bf16.mxu0 %v1514_v0 }
 0x511   :  { %1395 = vmatpush3.bf16.msra.mxu0 %v1394_v36 }
 0x514   :  { %1281 = vmatmul.mubr.msk.f32.vlgmr.msra.gmra.mrb[8].mxu0 %vm182_vm1, %v1021_v39 }
 0x5cf   :  { %v608_v4 = vpop.f32.mrb[2].mxu0 }
 0x5d0   :  { %v1249_v5 = vpop.f32.mrb[3].mxu0 }
 0x5d7   :  { %v681_v6 = vpop.f32.mrb[4].mxu0 }
 0x5d8   :  { %v682_v7 = vadd.f32 %v681_v6, %v608_v4  ;;  %v1260_v8 = vpop.f32.mrb[5].mxu0 }
 0x5df   :  { %v758_v10 = vpop.f32.mrb[6].mxu0 }
 0x5e0   :  { %v762_v11 = vadd.f32 %v758_v10, %v682_v7  ;;  %v1271_v12 = vpop.f32.mrb[7].mxu0 }
 0x5e2   :  { %v767_v13 = vadd.f32 %v1029_v9, %v762_v11 }
 0x5e4   :  { %1421 = vtanh.f32 %v767_v13  ;;  %v1030_v15 = vmul.f32 -1.442695, %v767_v13 }
 0x5e6   :  { %1423 = vpow2.f32 %v1030_v15 }
 0x5e7   :  { %v873_v44 = vpop.f32.mrb[8].mxu0 }
 0x5e8   :  { %v1282_v0 = vpop.f32.mrb[9].mxu0 }
 0x5ee   :  { %v1422_v14 = vpop.eup %1421 }
 0x5ef   :  { %781 = vrot.lane.b32.xlu1 %v1422_v14, %s1517_s30 }
 0x5f0   :  { %v1424_v17 = vpop.eup %1423 }
 0x5f1   :  { %v771_v18 = vadd.f32 1.0, %v1424_v17 }
 0x5f3   :  { %776 = vrot.lane.b32.xlu1 %v89_v1, %s1518_s17  ;;  %1425 = vrcp.f32 %v771_v18 }
 0x5fd   :  { %v1426_v19 = vpop.eup %1425 }
 0x661   :  { %v782_v20 = vpop.permute.xlu1 %781 }
 0x662   :  { %v784_v21 = vmul.f32 %v1426_v19, %v782_v20 }
 0x664   :  { %786 = vrot.lane.b32.xlu0 %v784_v21, %s1518_s17 }
 0x665   :  { %v777_v22 = vpop.permute.xlu1 %776 }
 0x666   :  { %v779_v23 = vmul.f32 %v1426_v19, %v777_v22 }
 0x6d6   :  { %v787_v24 = vpop.permute.xlu0 %786 }
 0x6d7   :  { %v789_v25 = vadd.f32 %v787_v24, %v779_v23 }
 0x6d9   :  { %1427 = vtanh.f32 %v789_v25 }
 0x6e3   :  { %v1428_v38 = vpop.eup %1427 }
 0x6e4   :  { %792 = vrot.lane.b32.xlu1 %v1428_v38, %s1517_s30 }
 0x756   :  { %v793_v40 = vpop.permute.xlu1 %792 }
 0x757   :  { %v795_v41 = vmul.f32 %v1426_v19, %v793_v40 }
 0x759   :  { %878 = vrot.lane.b32.xlu1 %v795_v41, %s1518_s17 }
 0x7cb   :  { %v879_v42 = vpop.permute.xlu1 %878 }
 0x7cc   :  { %1292 = vmatmul.mubr.msk.f32.vlgmr.msra.gmra.mrb[6].mxu1 %vm182_vm1, %v879_v42 }
 0x89f   :  { %v948_v46 = vpop.f32.mrb[6].mxu1 }
 0x8a0   :  { %v949_v47 = vadd.f32 %v948_v46, %v873_v44  ;;  %v1293_v48 = vpop.f32.mrb[7].mxu1 }
 0x8a2   :  { %v956_v49 = vadd.f32 %v1033_v45, %v949_v47 }
 0x8a4   :  { %1429 = vtanh.f32 %v956_v49  ;;  %v1034_v52 = vmul.f32 -1.442695, %v956_v49 }
 0x8a6   :  { %1431 = vpow2.f32 %v1034_v52 }
 0x8ae   :  { %v1430_v50 = vpop.eup %1429 }
 0x8af   :  { %970 = vrot.lane.b32.xlu1 %v1430_v50, %s1517_s30 }
 0x8b0   :  { %v1432_v53 = vpop.eup %1431 }
 0x8b1   :  { %v960_v54 = vadd.f32 1.0, %v1432_v53 }
 0x8b3   :  { %965 = vrot.lane.b32.xlu1 %v1022_v51, %s1518_s17  ;;  %1433 = vrcp.f32 %v960_v54 }
 0x8b4   :  { %1435 = vrcp.f32 %v84_v59 }
 0x8bd   :  { %v1434_v55 = vpop.eup %1433 }
 0x8be   :  { %v1436_v62 = vpop.eup %1435 }
 0x8bf   :  { %v527_v3 = vmul.f32 %v1436_v62, %v1687_v16 }
 0x8c1   :  { %v528_v4 = vsub.f32 %v1683_v63, %v527_v3 }
 0x921   :  { %v971_v56 = vpop.permute.xlu1 %970 }
 0x922   :  { %v973_v57 = vmul.f32 %v1434_v55, %v971_v56 }
 0x924   :  { %975 = vrot.lane.b32.xlu1 %v973_v57, %s1518_s17 }
 0x925   :  { %v966_v43 = vpop.permute.xlu1 %965 }
 0x926   :  { %v968_v58 = vmul.f32 %v1434_v55, %v966_v43 }
 0x996   :  { %v976_v60 = vpop.permute.xlu1 %975 }
 0x997   :  { %v978_v61 = vadd.f32 %v976_v60, %v968_v58 }
 0x999   :  { %1437 = vtanh.f32 %v978_v61 }
 0x9a3   :  { %v1438_v2 = vpop.eup %1437 }
 0x9a4   :  { %981 = vrot.lane.b32.xlu1 %v1438_v2, %s1517_s30 }
 0x9a8   :  { %991 = vrot.lane.b32.xlu1 %v789_v25, %s1518_s17 }
 0x9ac   :  { %1005 = vrot.lane.b32.xlu1 %v528_v4, %s1519_s6 }
 0xa16   :  { %v982_v5 = vpop.permute.xlu1 %981 }
 0xa17   :  { %v984_v6 = vmul.f32 %v1434_v55, %v982_v5 }
 0xa19   :  { %987 = vrot.lane.b32.xlu0 %v984_v6, %s1517_s30 }
 0xa1a   :  { %v992_v7 = vpop.permute.xlu1 %991 }
 0xa1d   :  { %995 = vrot.lane.b32.xlu0 %v978_v61, %s1517_s30 }
 0xa1e   :  { %v1006_v8 = vpop.permute.xlu1 %1005 }
 0xa1f   :  { %v1008_v9 = vsel %vm362_vm3, %v1687_v16, %v1006_v8 }
 0xa20   :  { %1010 = vst.msk [vmem:[%s1782_s12] sm:$0x3] %vm1009_vm5, %v1008_v9 }
 0xa8b   :  { %v988_v10 = vpop.permute.xlu0 %987 }
 0xa8c   :  { %v998_v63 = vsel %vm182_vm1, %v879_v42, %v988_v10 }
 0xa8d   :  { %v1000_v12 = vsel %vm999_vm6, %v998_v63, %v992_v7 }
 0xa8f   :  { %v996_v11 = vpop.permute.xlu0 %995 }
 0xa90   :  { %v1002_v13 = vsel %vm1001_vm7, %v1000_v12, %v996_v11 }
 0xa91   :  { %1003 = vst [vmem:[%s1781_s11] sm:$0x3] %v1002_v13 }
 0xa92   :  { %1019 = vsyncpa [#allocation3], 1 }
 0xa93   :  { %1020 = vsyncpa [#allocation5], 1 }

</bundles_post_ra>
